<compile_context>
chip_gen: v6e
topology: v6e:2x2x1
jax: 0.10.0
libtpu: 0.0.40
codegen_flags: <defaults>
</compile_context>

<pallas_src>
import jax
import jax.numpy as jnp
from jax import lax
from jax.experimental import pallas as pl
from jax.experimental.pallas import tpu as pltpu


def _round_up(x, m):
    return (x + m - 1) // m * m


def _encode_seq_kernel(len_ref, emb_ref, w_ref, b_ref, out_ref, acc_ref):
    """Streamed masked-sum pooling over L chunks + fused llama_proj.

    Grid: (batch tiles, L chunks).  The L axis is an accumulation axis: the
    (tb, R) f32 accumulator lives in VMEM scratch, is zeroed at l == 0; the
    mean + MXU projection + store happen only at the last L step.

    len_ref : VMEM (tb, 1)      int32  valid sequence lengths
    emb_ref : VMEM (tb, tl, R)  bf16   gathered item embeddings (one L chunk)
    w_ref   : VMEM (R, Hp)      bf16   llama_proj.weight (in, out), H padded
    b_ref   : VMEM (1, Hp)      f32    llama_proj.bias, H padded
    out_ref : VMEM (tb, Hp)     bf16   projected sequence embeddings
    acc_ref : VMEM (tb, R)      f32    running masked sum over L
    """
    l_step = pl.program_id(1)
    tb, tl, _ = emb_ref.shape

    @pl.when(l_step == 0)
    def _():
        acc_ref[...] = jnp.zeros_like(acc_ref)

    lens = len_ref[...]                                           # (tb, 1) i32
    pos = l_step * tl + lax.broadcasted_iota(jnp.int32, (tb, tl), 1)
    # Binary mask in bf16 (exact multiply): bf16 VALU on v6e/v7x processes 2x
    # elements per vreg op; v5e transparently emulates in f32.
    mask = (pos < lens).astype(emb_ref.dtype)                     # (tb, tl)
    masked = emb_ref[...] * mask[:, :, None]                      # (tb, tl, R)
    acc_ref[...] += jnp.sum(masked.astype(jnp.float32), axis=1)   # (tb, R) f32

    @pl.when(l_step == pl.num_programs(1) - 1)
    def _():
        # 1/len on the EUP slot, folded into the tiny (tb, R) pooled tensor.
        inv_len = pl.reciprocal(jnp.maximum(lens.astype(jnp.float32), 1.0),
                                approx=True)                      # (tb, 1)
        pooled = acc_ref[...] * inv_len                           # (tb, R) f32
        # One dense MXU matmul: bf16 operands, f32 accumulate.
        proj = jnp.dot(pooled.astype(jnp.bfloat16), w_ref[...],
                       preferred_element_type=jnp.float32)        # (tb, Hp)
        out_ref[...] = (proj + b_ref[...]).astype(out_ref.dtype)


def encode_seq(seq, len_seq, item_emb, w_proj, b_proj, *, block_rows=256):
    """Pallas implementation of RecInt.encode_seq (SASRec branch).

    seq      : (B, L) int32 item ids
    len_seq  : (B,)   int32 valid lengths
    item_emb : (V, R) f32   recommender item embedding table
    w_proj   : (R, H) f32   llama_proj weight (in_features, out_features)
    b_proj   : (H,)   f32   llama_proj bias
    returns  : seq_input_llama (B, H) bf16, seq_atts_llama (B,) int32
    """
    B, L = seq.shape
    _, R = item_emb.shape
    H = w_proj.shape[1]

    Hp = _round_up(H, 128)                 # lane-dense projection output
    # L chunk: whole (8-aligned) sequence when short, else 128-position chunks
    # so the emb DMA pipelines over L and per-step VMEM stays bounded.
    tl = _round_up(L, 8) if L <= 128 else 128
    Lp = _round_up(L, tl)

    # ---- generation-aware VMEM budget -> batch tile ------------------------
    try:
        vmem_cap = int(pltpu.get_tpu_info().vmem_capacity_bytes)
    except Exception:                      # fallback: assume v7x (64 MiB)
        vmem_cap = 64 << 20
    budget = min(int(vmem_cap * 0.6), 96 << 20)

    def _step_bytes(tb):
        emb_b = tb * tl * R * 2            # bf16 emb chunk (double-buffered)
        out_b = tb * Hp * 2                # bf16 output tile
        len_b = tb * 4
        acc_b = tb * R * 4                 # resident f32 accumulator
        w_b = R * Hp * 2 + Hp * 4          # resident weight + bias
        return 2 * (emb_b + out_b + len_b) + acc_b + 2 * w_b

    tb = _round_up(min(block_rows, _round_up(B, 8)), 8)   # sublane-aligned
    while tb > 8 and _step_bytes(tb) > budget:
        tb = max(8, (tb // 2) // 8 * 8)
    # >= 4 batch steps when possible: v7x shards the 'parallel' axis over its
    # 2 TensorCores; >= 2 steps/core keeps DMA/compute overlapped.
    while tb > 8 and -(-B // tb) < 4:
        tb = max(8, (tb // 2) // 8 * 8)
    Bp = _round_up(B, tb)

    # Item-embedding gather stays in the wrapper (data-dependent row lookup),
    # done in bf16 and WITHOUT padding R (kernel blocks use the full last dim).
    seq_p = jnp.zeros((Bp, Lp), jnp.int32).at[:B, :L].set(seq.astype(jnp.int32))
    emb = item_emb.astype(jnp.bfloat16)[seq_p]                    # (Bp, Lp, R)

    lens = jnp.zeros((Bp, 1), jnp.int32).at[:B, 0].set(
        len_seq.astype(jnp.int32))

    w = w_proj.astype(jnp.bfloat16)
    bias = b_proj.astype(jnp.float32).reshape(1, H)
    if Hp != H:
        w = jnp.pad(w, ((0, 0), (0, Hp - H)))
        bias = jnp.pad(bias, ((0, 0), (0, Hp - H)))

    grid = (Bp // tb, Lp // tl)

    vmem_limit = int(min(max(int(1.5 * _step_bytes(tb)) + (2 << 20), 16 << 20),
                         min(int(vmem_cap * 0.75), 100 << 20)))

    out = pl.pallas_call(
        _encode_seq_kernel,
        out_shape=jax.ShapeDtypeStruct((Bp, Hp), jnp.bfloat16),
        grid_spec=pltpu.PrefetchScalarGridSpec(
            num_scalar_prefetch=0,
            grid=grid,
            in_specs=[
                pl.BlockSpec((tb, 1), lambda i, l: (i, 0)),
                pl.BlockSpec((tb, tl, R), lambda i, l: (i, l, 0)),
                pl.BlockSpec((R, Hp), lambda i, l: (0, 0)),
                pl.BlockSpec((1, Hp), lambda i, l: (0, 0)),
            ],
            out_specs=pl.BlockSpec((tb, Hp), lambda i, l: (i, 0)),
            scratch_shapes=[pltpu.VMEM((tb, R), jnp.float32)],
        ),
        compiler_params=pltpu.CompilerParams(
            dimension_semantics=("parallel", "arbitrary"),
            vmem_limit_bytes=vmem_limit),
    )(lens, emb, w, bias)

    seq_input_llama = out[:B, :H]                                 # (B, H) bf16
    # torch.ones(seq_input_llama.size()[:-1], dtype=torch.long)
    seq_atts_llama = jnp.ones((B,), dtype=jnp.int32)
    return seq_input_llama, seq_atts_llama


if __name__ == "__main__":
    # Small synthetic config (args.rec_size, llama hidden, etc.)
    B, L = 16, 8         # batch, max sequence length
    V = 50               # number of items in the recommender vocab
    R = 64               # args.rec_size
    H = 128              # llama_model.config.hidden_size (tiny synthetic)

    key = jax.random.PRNGKey(0)
    k_item, k_w, k_b, k_seq, k_len = jax.random.split(key, 5)

    # Deterministic synthetic parameters (shapes from module __init__).
    item_embeddings = jax.random.normal(k_item, (V, R), dtype=jnp.float32) * 0.02
    llama_proj_w = jax.random.normal(k_w, (R, H), dtype=jnp.float32) * 0.02
    llama_proj_b = jax.random.normal(k_b, (H,), dtype=jnp.float32) * 0.01

    # Synthetic samples['seq'], samples['len_seq'].
    seq = jax.random.randint(k_seq, (B, L), 1, V, dtype=jnp.int32)
    len_seq = jax.random.randint(k_len, (B,), 1, L + 1, dtype=jnp.int32)

    seq_input_llama, seq_atts_llama = encode_seq(
        seq, len_seq, item_embeddings, llama_proj_w, llama_proj_b)
    jax.block_until_ready((seq_input_llama, seq_atts_llama))

    # Pure-JAX f32 reference for the same stand-in encoder + projection.
    emb_f = item_embeddings[seq]
    mask = (jnp.arange(L)[None, :] < len_seq[:, None]).astype(jnp.float32)
    pooled = (emb_f * mask[..., None]).sum(1) / jnp.maximum(
        len_seq.astype(jnp.float32), 1.0)[:, None]
    ref = pooled @ llama_proj_w + llama_proj_b

    assert seq_input_llama.shape == (B, H)
    assert seq_atts_llama.shape == (B,)
    # bf16 gather / MXU operands / output + approx reciprocal -> loose tol.
    out_f32 = seq_input_llama.astype(jnp.float32)
    assert jnp.allclose(out_f32, ref, atol=3e-3, rtol=3e-2), (
        float(jnp.max(jnp.abs(out_f32 - ref))))

    print("KERNEL_OK")
</pallas_src>

<mosaic_0001>
module attributes {stable_mosaic.version = 11 : i64} {
  func.func @_encode_seq_kernel(%arg0: i32, %arg1: i32, %arg2: memref<8x1xi32, #tpu.memory_space<vmem>>, %arg3: memref<8x8x64xbf16, #tpu.memory_space<vmem>>, %arg4: memref<64x128xbf16, #tpu.memory_space<vmem>>, %arg5: memref<1x128xf32, #tpu.memory_space<vmem>>, %arg6: memref<8x128xbf16, #tpu.memory_space<vmem>>, %arg7: memref<8x64xf32, #tpu.memory_space<vmem>>) attributes {dimension_semantics = [#tpu.dimension_semantics<parallel>, #tpu.dimension_semantics<arbitrary>], iteration_bounds = array<i64: 2, 1>, scalar_prefetch = 0 : i64, scratch_operands = 1 : i64, tpu.core_type = #tpu.core_type<tc>, window_params = [{transform_indices = @transform_0, window_bounds = array<i64: 8, 1>}, {transform_indices = @transform_1, window_bounds = array<i64: 8, 8, 64>}, {pipeline_mode = #tpu.pipeline_mode<synchronous>, transform_indices = @transform_2, window_bounds = array<i64: 64, 128>}, {pipeline_mode = #tpu.pipeline_mode<synchronous>, transform_indices = @transform_3, window_bounds = array<i64: 1, 128>}, {transform_indices = @transform_4, window_bounds = array<i64: 8, 128>}]} {
    %c0_i32 = arith.constant 0 : i32
    %0 = arith.cmpi eq, %arg1, %c0_i32 : i32
    %1 = arith.extui %0 : i1 to i32
    %c0_i32_0 = arith.constant 0 : i32
    %2 = arith.cmpi ne, %1, %c0_i32_0 : i32
    scf.if %2 {
      %cst_11 = arith.constant 0.000000e+00 : f32
      %25 = vector.broadcast %cst_11 : f32 to vector<8x64xf32>
      %c0_12 = arith.constant 0 : index
      %c0_13 = arith.constant 0 : index
      %26 = vector.load %arg7[%c0_12, %c0_13] : memref<8x64xf32, #tpu.memory_space<vmem>>, vector<8x64xf32>
      tpu.vector_store %arg7[%c0_12, %c0_13], %25 {strides = array<i32>} : memref<8x64xf32, #tpu.memory_space<vmem>>, vector<8x64xf32>,
    } else {
    }
    %c0 = arith.constant 0 : index
    %c0_1 = arith.constant 0 : index
    %3 = vector.load %arg2[%c0, %c0_1] : memref<8x1xi32, #tpu.memory_space<vmem>>, vector<8x1xi32>
    %c8_i32 = arith.constant 8 : i32
    %4 = arith.muli %arg1, %c8_i32 : i32
    %5 = tpu.iota {dimensions = array<i32: 1>} : vector<8x8xi32>
    %6 = vector.broadcast %4 : i32 to vector<8x8xi32>
    %7 = arith.addi %6, %5 : vector<8x8xi32>
    %8 = vector.broadcast %3 : vector<8x1xi32> to vector<8x8xi32>
    %9 = arith.cmpi slt, %7, %8 : vector<8x8xi32>
    %10 = arith.extui %9 : vector<8x8xi1> to vector<8x8xi32>
    %11 = arith.sitofp %10 : vector<8x8xi32> to vector<8x8xf32>
    %12 = arith.truncf %11 : vector<8x8xf32> to vector<8x8xbf16>
    %c0_2 = arith.constant 0 : index
    %c0_3 = arith.constant 0 : index
    %c0_4 = arith.constant 0 : index
    %13 = vector.load %arg3[%c0_2, %c0_3, %c0_4] : memref<8x8x64xbf16, #tpu.memory_space<vmem>>, vector<8x8x64xbf16>
    %14 = vector.shape_cast %12 : vector<8x8xbf16> to vector<8x8x1xbf16>
    %15 = vector.broadcast %14 : vector<8x8x1xbf16> to vector<8x8x64xbf16>
    %16 = arith.mulf %13, %15 : vector<8x8x64xbf16>
    %c0_5 = arith.constant 0 : index
    %c0_6 = arith.constant 0 : index
    %17 = vector.load %arg7[%c0_5, %c0_6] : memref<8x64xf32, #tpu.memory_space<vmem>>, vector<8x64xf32>
    %18 = arith.extf %16 : vector<8x8x64xbf16> to vector<8x8x64xf32>
    %cst = arith.constant dense<0.000000e+00> : vector<8x64xf32>
    %19 = vector.multi_reduction <add>, %18, %cst [1] : vector<8x8x64xf32> to vector<8x64xf32>
    %20 = arith.addf %17, %19 : vector<8x64xf32>
    %c0_7 = arith.constant 0 : index
    %c0_8 = arith.constant 0 : index
    %21 = vector.load %arg7[%c0_7, %c0_8] : memref<8x64xf32, #tpu.memory_space<vmem>>, vector<8x64xf32>
    tpu.vector_store %arg7[%c0_7, %c0_8], %20 {strides = array<i32>} : memref<8x64xf32, #tpu.memory_space<vmem>>, vector<8x64xf32>,
    %c0_i32_9 = arith.constant 0 : i32
    %22 = arith.cmpi eq, %arg1, %c0_i32_9 : i32
    %23 = arith.extui %22 : i1 to i32
    %c0_i32_10 = arith.constant 0 : i32
    %24 = arith.cmpi ne, %23, %c0_i32_10 : i32
    scf.if %24 {
      %25 = arith.sitofp %3 : vector<8x1xi32> to vector<8x1xf32>
      %cst_11 = arith.constant 1.000000e+00 : f32
      %26 = vector.broadcast %cst_11 : f32 to vector<8x1xf32>
      %27 = arith.maximumf %25, %26 : vector<8x1xf32>
      %28 = tpu.reciprocal %27 {approx = true} : vector<8x1xf32> -> vector<8x1xf32>
      %c0_12 = arith.constant 0 : index
      %c0_13 = arith.constant 0 : index
      %29 = vector.load %arg7[%c0_12, %c0_13] : memref<8x64xf32, #tpu.memory_space<vmem>>, vector<8x64xf32>
      %30 = vector.broadcast %28 : vector<8x1xf32> to vector<8x64xf32>
      %31 = arith.mulf %29, %30 : vector<8x64xf32>
      %32 = arith.truncf %31 : vector<8x64xf32> to vector<8x64xbf16>
      %c0_14 = arith.constant 0 : index
      %c0_15 = arith.constant 0 : index
      %33 = vector.load %arg4[%c0_14, %c0_15] : memref<64x128xbf16, #tpu.memory_space<vmem>>, vector<64x128xbf16>
      %cst_16 = arith.constant dense<0.000000e+00> : vector<8x128xf32>
      %34 = tpu.matmul %32, %33, %cst_16 {dimension_numbers = #tpu.dot_dimension_numbers<[1], [0], [0], [1], [0, 0, 1, 1], [], []>} : vector<8x64xbf16>, vector<64x128xbf16>, vector<8x128xf32> -> vector<8x128xf32>
      %c0_17 = arith.constant 0 : index
      %c0_18 = arith.constant 0 : index
      %35 = vector.load %arg5[%c0_17, %c0_18] : memref<1x128xf32, #tpu.memory_space<vmem>>, vector<1x128xf32>
      %36 = vector.broadcast %35 : vector<1x128xf32> to vector<8x128xf32>
      %37 = arith.addf %34, %36 : vector<8x128xf32>
      %38 = arith.truncf %37 : vector<8x128xf32> to vector<8x128xbf16>
      %c0_19 = arith.constant 0 : index
      %c0_20 = arith.constant 0 : index
      %39 = vector.load %arg6[%c0_19, %c0_20] : memref<8x128xbf16, #tpu.memory_space<vmem>>, vector<8x128xbf16>
      tpu.vector_store %arg6[%c0_19, %c0_20], %38 {strides = array<i32>} : memref<8x128xbf16, #tpu.memory_space<vmem>>, vector<8x128xbf16>,
    } else {
    }
    return
  }
  func.func @transform_0(%arg0: i32, %arg1: i32) -> (i32, i32) {
    %c0_i32 = arith.constant 0 : i32
    %c0_i32_0 = arith.constant 0 : i32
    return %arg0, %c0_i32 : i32, i32
  }
  func.func @transform_1(%arg0: i32, %arg1: i32) -> (i32, i32, i32) {
    %c0_i32 = arith.constant 0 : i32
    %c0_i32_0 = arith.constant 0 : i32
    return %arg0, %arg1, %c0_i32 : i32, i32, i32
  }
  func.func @transform_2(%arg0: i32, %arg1: i32) -> (i32, i32) {
    %c0_i32 = arith.constant 0 : i32
    %c0_i32_0 = arith.constant 0 : i32
    %c0_i32_1 = arith.constant 0 : i32
    return %c0_i32, %c0_i32_0 : i32, i32
  }
  func.func @transform_3(%arg0: i32, %arg1: i32) -> (i32, i32) {
    %c0_i32 = arith.constant 0 : i32
    %c0_i32_0 = arith.constant 0 : i32
    %c0_i32_1 = arith.constant 0 : i32
    return %c0_i32, %c0_i32_0 : i32, i32
  }
  func.func @transform_4(%arg0: i32, %arg1: i32) -> (i32, i32) {
    %c0_i32 = arith.constant 0 : i32
    %c0_i32_0 = arith.constant 0 : i32
    return %arg0, %c0_i32 : i32, i32
  }
}

</mosaic_0001>

<bundles_post_ra>
// kernel: tpu_custom_call.1
= control target key start
LH: loop header
LB: loop body
LE: loop exit
PB: predicated region body
PF: predicated region fallthrough
CT: control target
= control target key end

     0   :  { %s1183_s0 = inlined_call_operand.vmem [shape: s32[16,1], index: 0, kind: input, shape index: {}]   ;;  %s1184_s1 = inlined_call_operand.hbm [shape: bf16[16,8,64], index: 1, kind: input, shape index: {}]   ;;  %s1185_s2 = inlined_call_operand.hbm [shape: bf16[64,128], index: 2, kind: input, shape index: {}]   ;;  %s1186_s3 = inlined_call_operand.vmem [shape: f32[1,128], index: 3, kind: input, shape index: {}]   ;;  %s1187_s4 = inlined_call_operand.hbm [shape: bf16[16,128], index: 4, kind: output, shape index: {}]  }
   0x1   :  { %1191 = sst [smem:[#allocation12_spill]] %s1185_s2 }
   0x2   :  { %9 = vsyncpa [#allocation4], 0 }
   0x3   :  { %11 = vsyncpa [#allocation4 + $0x1], 0 }
   0x4   :  { %12 = vsyncpa [#allocation7], 0 }
   0x5   :  { %13 = vsyncpa [#allocation5], 0 }
   0x6   :  { %15 = vsyncpa [#allocation5 + $0x1], 0  ;;  %s968_s15 = smov 0   ;;  %s970_s16 = smov 0  }
   0x7   :  { %s972_s17 = smov 0   ;;  %s974_s18 = smov 0  }
   0x8   :  { %s976_s19 = smov 0   ;;  %s978_s20 = smov 0  }
   0x9 LB: > { %s667_s21 = sadd.s32 4294967295, %s933_s20   ;;  %s668_s22 = sadd.s32 4294967294, %s933_s20   ;;  %s933_s20 = sphi %s978_s20, %s21_s20   ;;  %s929_s19 = sphi %s976_s19, %s1211_s19   ;;  %s925_s18 = sphi %s974_s18, %s1210_s18   ;;  %s921_s17 = sphi %s972_s17, %s1209_s17   ;;  %s917_s16 = sphi %s970_s16, %s1208_s16   ;;  %s913_s15 = sphi %s968_s15, %s1207_s15  }
   0xa   : > { %p81_p0 = scmp.ne.s32.totalorder %s917_s16, %s913_s15  ;;  %p1002_p1 = scmp.eq.s32.totalorder %s667_s21, 0 }
   0xb   : > { %p1006_p2 = scmp.eq.s32.totalorder %s667_s21, 1  ;;  %p153_p3 = scmp.eq.s32.totalorder %s668_s22, 1 }
   0xc   : > { %p1012_p4 = por %p1002_p1, %p81_p0  ;;  %p669_p5 = scmp.ge.s32.totalorder %s933_s20, 1 }
   0xd   : > { %p1017_p6 = por %p153_p3, %p81_p0  ;;  %p160_p7 = scmp.lt.s32.totalorder %s933_s20, 3 }
   0xe   : > { %s1194_s25 = scalar_select %p1012_p4, 1, 0 }
   0xf   : > { %s1195_s26 = scalar_select %p1017_p6, 1, 0 }
  0x10   : > { %p1022_p8 = pnand %p669_p5, %p160_p7  ;;  %s935_s28 = smov [#allocation6]  }
  0x11   : > { %s172_s29 = sshll.u32 %s935_s28, 4  ;;  %s33_s5 = sadd.s32 1, %s929_s19  ;;  %s173_s29 = int_to_ptr.vmem [resolvable:$true] %s172_s29 }
  0x12   : > { %p717_p9 = pneg %p1022_p8  ;;  %s806_s6 = scalar_lea.vmem %s173_s29, 512 }
  0x13   : > { %p807_p13 = scmp.ne.s32.totalorder %s173_s29, %s806_s6  ;;  %p814_p5 = scmp.lt.s32.totalorder %s173_s29, %s173_s29 }
  0x14   : > { %p1031_p11 = pnand %p717_p9, %p1002_p1  ;;  %p815_p7 = scmp.lt.s32.totalorder %s806_s6, %s806_s6 }
  0x16   : > { %p797_p12 = pneg %p1031_p11  ;;  %p816_p6 = por %p815_p7, %p814_p5 }
  0x18   : > { %p809_p0 = pnand %p807_p13, %p797_p12 }
  0x1a   : > { %p810_p3 = pneg %p809_p0 }
  0x1c   : > { %p817_p4 = pnand %p816_p6, %p810_p3 }
  0x1e   : > { %820 = shalt.err (!%p817_p4)
}
  0x1f   : > { %s1189_s7 = smov 64   ;;  %s1190_s8 = smov 4  }
  0x20   : > { %s1198_s2 = sld [smem:[#allocation12_spill]]  ;;  %p35_p4 = scmp.ge.s32.totalorder %s33_s5, 2 }
  0x21   : > { %s68_s11 = sadd.s32 1, %s921_s17  ;;  %p75_p6 = scmp.ne.s32.totalorder %s921_s17, %s917_s16 }
  0x22   : > { %p76_p9 = scmp.eq.s32.totalorder %s933_s20, 0  ;;  %s1213_s5 = smov (%p35_p4, %s33_s5), 0 }
  0x23   : > { %p1058_p13 = por %p1006_p2, %p75_p6  ;;  %s63_s14 = ssub.s32 %s929_s19, %s1213_s5 }
  0x24   : > { %p1052_p12 = por %p76_p9, %p75_p6  ;;  %p730_p0 = scmp.lt.s32.totalorder %s933_s20, 2 }
  0x25   : > { %s196_s21 = sand.u32 1, %s921_s17  }
  0x26   : > { %720 = dma.hbm_to_vmem [thread:$0]  (!%p1031_p11), %s1198_s2, 512, %s173_s29, [#allocation7], %s1189_s7, %s1189_s7, %s1190_s8  }
  0x27   : > { %p66_p11 = scmp.eq.s32.totalorder %s63_s14, 0  ;;  %s672_s22 = sshll.u32 %s196_s21, 5 }
  0x28   : > { %s691_s29 = sshll.u32 %s929_s19, 9  ;;  %s200_s10 = scalar_lea.vmem [#allocation3], %s672_s22 }
  0x29   : > { %s1067_s28 = scalar_select %p66_p11, %s921_s17, %s68_s11  }
  0x2a   : > { %s207_s9 = scalar_lea.hbm %s1184_s1, %s691_s29  ;;  %s208_s7 = sshll.u32 %s200_s10, 4  ;;  %s209_s7 = int_to_ptr.vmem [resolvable:$true] %s208_s7 }
  0x2b   : > { %p1075_p2 = pnand %p730_p0, %p1052_p12  ;;  %s197_s8 = scalar_lea.sflag [#allocation4], %s196_s21 }
  0x2c   : > { %s834_s14 = scalar_lea.vmem %s209_s7, 512  ;;  %s938_s11 = smov [#allocation3]  }
  0x2d   : > { %p823_p3 = pneg %p1075_p2  ;;  %p835_p5 = scmp.ne.s32.totalorder %s209_s7, %s834_s14 }
  0x2e   : > { %s839_s2 = sshll.u32 %s938_s11, 4  ;;  %s840_s2 = int_to_ptr.vmem [resolvable:$false] %s839_s2 }
  0x2f   : > { %p837_p7 = pnand %p835_p5, %p823_p3  ;;  %s841_s29 = scalar_lea.vmem %s840_s2, 1024 }
  0x30   : > { %p842_p6 = scmp.lt.s32.totalorder %s209_s7, %s840_s2  ;;  %p843_p9 = scmp.lt.s32.totalorder %s841_s29, %s834_s14 }
  0x31   : > { %p838_p4 = pneg %p837_p7 }
  0x32   : > { %p844_p11 = por %p843_p9, %p842_p6 }
  0x34   : > { %p845_p10 = pnand %p844_p11, %p838_p4 }
  0x36   : > { %848 = shalt.err (!%p845_p10)
}
  0x37   : > { %s1202_s12 = smov 4   ;;  %s1203_s22 = smov 64  }
  0x38   : > { %724 = dma.hbm_to_vmem [thread:$0]  (!%p1075_p2), %s207_s9, 512, %s209_s7, %s197_s8, %s1203_s22, %s1203_s22, %s1202_s12  }
  0x39   : > { %220 = sbr.rel (%p1022_p8) target bundleno = 575 (0x23f), region = 36  ;;  %s1089_s21 = sand.u32 (!%p1022_p8), 1, %s917_s16  }
  0x3a   : > { %s676_s2 = sshll.u32 (!%p1022_p8), %s1089_s21, 5  ;;  %s223_s30 = scalar_lea.sflag (!%p1022_p8), [#allocation4], %s1089_s21 }
  0x3b   : > { %s1093_s6 = scalar_lea.vmem (!%p1022_p8), [#allocation3], %s676_s2  ;;  %p1204_p10 = scmp.ne.s32.totalorder (!%p1022_p8), %s1194_s25, 0 }
  0x3e   : > { %900 = dma.done.wait (%p1204_p10), %s223_s30, 512  }
  0x3f   : > { %902 = vsyncadd (%p1204_p10), %s223_s30, 4294966784 }
  0x40   : > { %904 = dma.done.wait (%p1002_p1), [#allocation7], 512  }
  0x41   : > { %906 = vsyncadd (%p1002_p1), [#allocation7], 4294966784  ;;  %p259_p8 = scmp.lt.s32.totalorder %s925_s18, 1  ;;  %vm269_vm0 = vcmask 523264   ;;  %v939_v0 = vmov 0   ;;  %v940_v1 = vmov 0.0   ;;  %v273_v3 = vlaneseq }
  0x42   : > { %787 = vset.pattern.permute.xlu0 %v939_v0  ;;  %270 = vst.msk [vmem:[#allocation2] sm:$0xff] %vm269_vm0, %v940_v1  ;;  %788 = vset.pattern.permute.xlu1 %v939_v0  ;;  %v789_v27 = vld [vmem:[#allocation6 + $0x18] sm:$0xff]   ;;  %v790_v28 = vld [vmem:[#allocation6 + $0x10] sm:$0xff]   ;;  %v791_v29 = vld [vmem:[#allocation6 + $0x8] sm:$0xff]   ;;  %vm941_vm2 = vmmov 0   ;;  %vm436_vm3 = vcmask 1041409  }
  0x43   : > { %s260_s27 = scalar_select %p259_p8, %s925_s18, 1  ;;  %697 = vmatprep.subr.bf16.mxu0 %v940_v1  ;;  %v274_v4 = vand.u32 127, %v273_v3  ;;  %v296_v5 = vshrl.u32 %v273_v3, 7  ;;  %v792_v30 = vld [vmem:[#allocation6] sm:$0xff]   ;;  %705 = vmatprep.mubr.msk.bf16.mxu0 %vm941_vm2, %v940_v1  ;;  %v286_v31 = vld [vmem:[%s1093_s6 + $0x8] sm:$0xf] }
  0x44   : > { %698 = vmatpush3.bf16.msra.mxu0 %v789_v27  ;;  %v284_v32 = vld [vmem:[%s1093_s6] sm:$0xf]  ;;  %v285_v37 = vld [vmem:[%s1093_s6 + $0x4] sm:$0xf]  ;;  %v287_v38 = vld [vmem:[%s1093_s6 + $0xc] sm:$0xf] }
  0x45   : > { %s679_s25 = sshll.u32 %s260_s27, 3  ;;  %v314_v10 = vsub.s32 1, %v296_v5  ;;  %v297_v11 = vsub.s32 0, %v296_v5  ;;  %v328_v20 = vsub.s32 2, %v296_v5  ;;  %v342_v23 = vsub.s32 3, %v296_v5  ;;  %699 = vmatprep.subr.bf16.mxu0 %v940_v1  ;;  %s678_s23 = sshll.u32 %s1089_s21, 2 }
  0x46   : > { %s262_s9 = scalar_lea.vmem %s1183_s0, %s679_s25  ;;  %v288_v49 = vld [vmem:[%s1093_s6 + $0x10] sm:$0xf]  ;;  %v289_v50 = vld [vmem:[%s1093_s6 + $0x14] sm:$0xf]  ;;  %v290_v61 = vld [vmem:[%s1093_s6 + $0x18] sm:$0xf] }
  0x47   : > { %v271_v2 = vld [vmem:[%s262_s9] sm:$0xff]  ;;  %vm438_vm4 = vcmask 1042434   ;;  %vm440_vm5 = vcmask 1043459   ;;  %vm442_vm6 = vcmask 1044484   ;;  %vm444_vm7 = vcmask 1045509   ;;  %s688_s14 = sshll.u32 %s925_s18, 6 }
  0x48   : > { %278 = vperm.xlu0 %787, %v271_v2   ;;  %v456_v7 = vcvt.s32.f32 %v271_v2  ;;  %700 = vmatpush3.bf16.msra.mxu0 %v790_v28  ;;  %v291_v2 = vld [vmem:[%s1093_s6 + $0x1c] sm:$0xf]  ;;  %vm446_vm8 = vcmask 1046534   ;;  %vm448_vm9 = vcmask 1047559   ;;  %s258_s11 = scalar_lea.vmem [#allocation8], %s678_s23  ;;  %s1135_s2 = scalar_lea.hbm %s1187_s4, %s688_s14 }
  0x49   : > { %701 = vmatprep.subr.bf16.mxu0 %v940_v1  ;;  %s565_s29 = sshll.u32 %s258_s11, 4  ;;  %s552_s30 = scalar_lea.sflag [#allocation5], %s1089_s21  ;;  %s1137_s29 = int_to_ptr.vmem [resolvable:$true] %s565_s29 }
  0x4a   : > { %v457_v12 = vmax.f32 %v456_v7, 1.0  ;;  %s849_s18 = scalar_lea.vmem %s1137_s29, 64  ;;  %s942_s6 = smov [#allocation8]  }
  0x4b   : > { %p850_p1 = scmp.ne.s32.totalorder %s1137_s29, %s849_s18  ;;  %s853_s27 = sshll.u32 %s942_s6, 4  ;;  %s854_s27 = int_to_ptr.vmem [resolvable:$false] %s853_s27 }
  0x4c   : > { %793 = vrcp.f32 %v457_v12  ;;  %702 = vmatpush3.bf16.msra.mxu0 %v791_v29  ;;  %s855_s25 = scalar_lea.vmem %s854_s27, 128  ;;  %p856_p2 = scmp.lt.s32.totalorder %s1137_s29, %s854_s27 }
  0x4d   : > { %703 = vmatprep.subr.bf16.mxu0 %v940_v1  ;;  %p851_p12 = pnand %p850_p1, %p1058_p13  ;;  %p857_p3 = scmp.lt.s32.totalorder %s855_s25, %s849_s18 }
  0x4f   : > { %p852_p0 = pneg %p851_p12  ;;  %p858_p5 = por %p857_p3, %p856_p2 }
  0x50   : > { %704 = vmatpush3.bf16.msra.mxu0 %v792_v30 }
  0x51   : > { %p859_p7 = pnand %p858_p5, %p852_p0 }
  0x59   : > { %v794_v26 = vpop.eup %793 }
  0xc3   : > { %v279_v6 = vpop.permute.xlu0 %278 }
  0xc4   : > { %vm280_vm1 = vcmp.lt.s32.totalorder %v274_v4, %v279_v6 }
  0xc5   : > { %v680_v8 = vsel %vm280_vm1, 1.0, %v940_v1 }
  0xc6   : > { %v283_v9 = vpack.c.bf16 %v680_v8, %v680_v8 }
  0xc8   : > { %v293_v13 = vpack.i.b16 %v283_v9, %v283_v9  ;;  %v302_v14 = vshrl.u32 %v283_v9, 16 }
  0xca   : > { %v303_v15 = vpack.i.b16 %v302_v14, %v302_v14  ;;  %v315_v16 = vrot.slane %v293_v13, %v314_v10  ;;  %v298_v17 = vrot.slane %v293_v13, %v297_v11  ;;  %v329_v21 = vrot.slane %v293_v13, %v328_v20 }
  0xcb   : > { %v343_v24 = vrot.slane %v293_v13, %v342_v23 }
  0xcc   : > { %317 = vbcast.lane.c.b16.xlu1 %v315_v16, 256  ;;  %300 = vbcast.lane.c.b16.xlu0 %v298_v17, 256  ;;  %v308_v18 = vrot.slane %v303_v15, %v297_v11  ;;  %v322_v19 = vrot.slane %v303_v15, %v314_v10  ;;  %v336_v22 = vrot.slane %v303_v15, %v328_v20 }
  0xcd   : > { %v350_v25 = vrot.slane %v303_v15, %v342_v23 }
  0xd0   : > { %310 = vbcast.lane.c.b16.xlu1 %v308_v18, 256  ;;  %324 = vbcast.lane.c.b16.xlu0 %v322_v19, 256 }
  0xd4   : > { %331 = vbcast.lane.c.b16.xlu1 %v329_v21, 256  ;;  %338 = vbcast.lane.c.b16.xlu0 %v336_v22, 256 }
  0xd8   : > { %345 = vbcast.lane.c.b16.xlu1 %v343_v24, 256  ;;  %352 = vbcast.lane.c.b16.xlu0 %v350_v25, 256 }
  0xdc   : > { %462 = vperm.xlu1 %788, %v794_v26  }
 0x13e   : > { %v318_v33 = vpop.permute.xlu1 %317  ;;  %v301_v34 = vpop.permute.xlu0 %300 }
 0x13f   : > { %v356_v35 = vmul.bf16 %v318_v33, %v286_v31  ;;  %v354_v36 = vmul.bf16 %v301_v34, %v284_v32 }
 0x141   : > { %v365_v39 = vunpack.c.l.bf16 %v356_v35  ;;  %v363_v40 = vunpack.c.l.bf16 %v354_v36 }
 0x142   : > { %v311_v41 = vpop.permute.xlu1 %310  ;;  %v325_v42 = vpop.permute.xlu0 %324 }
 0x143   : > { %v386_v43 = vsel %vm269_vm0, %v365_v39, 0.0  ;;  %v372_v44 = vsel %vm269_vm0, %v363_v40, 0.0  ;;  %v355_v45 = vmul.bf16 %v311_v41, %v285_v37  ;;  %v357_v46 = vmul.bf16 %v325_v42, %v287_v38 }
 0x144   : > { %v387_v47 = vrot.slane %v386_v43, 4  ;;  %v373_v48 = vrot.slane %v372_v44, 4 }
 0x145   : > { %v364_v51 = vunpack.c.l.bf16 %v355_v45  ;;  %v366_v52 = vunpack.c.l.bf16 %v357_v46 }
 0x146   : > { %v388_v53 = vadd.f32 %v387_v47, %v386_v43  ;;  %v374_v54 = vadd.f32 %v373_v48, %v372_v44  ;;  %v332_v55 = vpop.permute.xlu1 %331  ;;  %v339_v56 = vpop.permute.xlu0 %338 }
 0x147   : > { %v379_v57 = vsel %vm269_vm0, %v364_v51, 0.0  ;;  %v393_v58 = vsel %vm269_vm0, %v366_v52, 0.0  ;;  %v358_v59 = vmul.bf16 %v332_v55, %v288_v49  ;;  %v359_v60 = vmul.bf16 %v339_v56, %v289_v50 }
 0x148   : > { %v389_v62 = vrot.slane %v388_v53, 2  ;;  %v375_v63 = vrot.slane %v374_v54, 2  ;;  %v380_v0 = vrot.slane %v379_v57, 4  ;;  %v394_v1 = vrot.slane %v393_v58, 4 }
 0x149   : > { %v367_v3 = vunpack.c.l.bf16 %v358_v59  ;;  %v368_v4 = vunpack.c.l.bf16 %v359_v60  ;;  %v362_v60 = vld [vmem:[#allocation2] sm:$0xff] }
 0x14a   : > { %v390_v5 = vadd.f32 %v389_v62, %v388_v53  ;;  %v376_v6 = vadd.f32 %v375_v63, %v374_v54  ;;  %v381_v7 = vadd.f32 %v380_v0, %v379_v57  ;;  %v395_v8 = vadd.f32 %v394_v1, %v393_v58  ;;  %v346_v9 = vpop.permute.xlu1 %345  ;;  %v353_v10 = vpop.permute.xlu0 %352 }
 0x14b   : > { %v400_v11 = vsel %vm269_vm0, %v367_v3, 0.0  ;;  %v407_v12 = vsel %vm269_vm0, %v368_v4, 0.0  ;;  %v360_v13 = vmul.bf16 %v346_v9, %v290_v61  ;;  %v361_v14 = vmul.bf16 %v353_v10, %v291_v2  ;;  %v681_v4 = vld [vmem:[%s1186_s3] ss:$0 sm:$0xff] }
 0x14c   : > { %v382_v15 = vrot.slane %v381_v7, 2  ;;  %v396_v16 = vrot.slane %v395_v8, 2  ;;  %v401_v17 = vrot.slane %v400_v11, 4  ;;  %v408_v18 = vrot.slane %v407_v12, 4 }
 0x14d   : > { %v369_v19 = vunpack.c.l.bf16 %v360_v13  ;;  %v370_v20 = vunpack.c.l.bf16 %v361_v14  ;;  %v391_v21 = vrot.slane %v390_v5, 1  ;;  %v377_v22 = vrot.slane %v376_v6, 1 }
 0x14e   : > { %v383_v23 = vadd.f32 %v382_v15, %v381_v7  ;;  %v397_v24 = vadd.f32 %v396_v16, %v395_v8  ;;  %v402_v25 = vadd.f32 %v401_v17, %v400_v11  ;;  %v409_v26 = vadd.f32 %v408_v18, %v407_v12 }
 0x14f   : > { %v414_v27 = vsel %vm269_vm0, %v369_v19, 0.0  ;;  %v421_v28 = vsel %vm269_vm0, %v370_v20, 0.0  ;;  %v378_v35 = vadd.f32 %v377_v22, %v376_v6  ;;  %v392_v39 = vadd.f32 %v391_v21, %v390_v5 }
 0x150   : > { %v384_v29 = vrot.slane %v383_v23, 1  ;;  %v398_v30 = vrot.slane %v397_v24, 1  ;;  %v415_v31 = vrot.slane %v414_v27, 4  ;;  %v422_v32 = vrot.slane %v421_v28, 4 }
 0x151   : > { %v403_v33 = vrot.slane %v402_v25, 2  ;;  %v410_v34 = vrot.slane %v409_v26, 2 }
 0x152   : > { %v385_v36 = vadd.f32 %v384_v29, %v383_v23  ;;  %v416_v37 = vadd.f32 %v415_v31, %v414_v27  ;;  %v423_v38 = vadd.f32 %v422_v32, %v421_v28  ;;  %v399_v43 = vadd.f32 %v398_v30, %v397_v24 }
 0x153   : > { %v404_v40 = vadd.f32 %v403_v33, %v402_v25  ;;  %v411_v41 = vadd.f32 %v410_v34, %v409_v26 }
 0x154   : > { %v437_v42 = vsel %vm436_vm3, %v385_v36, %v378_v35  ;;  %v417_v44 = vrot.slane %v416_v37, 2  ;;  %v424_v45 = vrot.slane %v423_v38, 2 }
 0x155   : > { %v439_v46 = vsel %vm438_vm4, %v392_v39, %v437_v42  ;;  %v405_v47 = vrot.slane %v404_v40, 1  ;;  %v412_v48 = vrot.slane %v411_v41, 1 }
 0x156   : > { %v441_v49 = vsel %vm440_vm5, %v399_v43, %v439_v46  ;;  %v418_v50 = vadd.f32 %v417_v44, %v416_v37  ;;  %v425_v51 = vadd.f32 %v424_v45, %v423_v38 }
 0x157   : > { %v406_v52 = vadd.f32 %v405_v47, %v404_v40  ;;  %v413_v53 = vadd.f32 %v412_v48, %v411_v41  ;;  %v463_v0 = vpop.permute.xlu1 %462 }
 0x158   : > { %v419_v54 = vrot.slane %v418_v50, 1  ;;  %v426_v55 = vrot.slane %v425_v51, 1 }
 0x159   : > { %v443_v56 = vsel %vm442_vm6, %v406_v52, %v441_v49 }
 0x15a   : > { %v420_v57 = vadd.f32 %v419_v54, %v418_v50  ;;  %v427_v58 = vadd.f32 %v426_v55, %v425_v51  ;;  %v445_v59 = vsel %vm444_vm7, %v413_v53, %v443_v56 }
 0x15c   : > { %v447_v61 = vsel %vm446_vm8, %v420_v57, %v445_v59 }
 0x15d   : > { %v449_v62 = vsel %vm448_vm9, %v427_v58, %v447_v61 }
 0x15e   : > { %v451_v63 = vadd.f32 %v449_v62, %v362_v60 }
 0x160   : > { %452 = vst.msk [vmem:[#allocation2] sm:$0xff] %vm269_vm0, %v451_v63 }
 0x167   : > { %v459_v1 = vld [vmem:[#allocation2] sm:$0xff] }
 0x168   : > { %v465_v2 = vmul.f32 %v463_v0, %v459_v1 }
 0x16a   : > { %v466_v3 = vpack.c.bf16 %v465_v2, %v465_v2 }
 0x16c   : > { %706 = vmatmul.mubr.msk.bf16.vlgmr.msra.gmra.mxu0 %vm269_vm0, %v466_v3 }
 0x22c   : > { %v543_v5 = vpop.f32.mrf.mxu0 }
 0x22d   : > { %v544_v6 = vadd.f32 %v681_v4, %v543_v5 }
 0x22e   : > { %v707_v7 = vpop.f32.mrf.mxu0 }
 0x22f   : > { %v549_v8 = vpack.c.bf16 %v544_v6, %v544_v6 }
 0x230   : > { %v546_v9 = vpop.f32.mrf.mxu0 }
 0x231   : > { %550 = vst [vmem:[%s258_s11] sm:$0xf] %v549_v8 }
 0x232   : > { %v708_v10 = vpop.f32.mrf.mxu0 }
 0x233   : > { %862 = shalt.err (!%p859_p7)
}
 0x234   : > { %s863_s7 = scalar_lea.hbm %s1135_s2, 64  ;;  %s867_s9 = scalar_lea.hbm %s1187_s4, 128 }
 0x235   : > { %p864_p4 = scmp.ne.s32.totalorder %s1135_s2, %s863_s7  ;;  %p868_p11 = scmp.lt.s32.totalorder %s1135_s2, %s1187_s4 }
 0x236   : > { %p869_p10 = scmp.lt.s32.totalorder %s867_s9, %s863_s7 }
 0x237   : > { %p865_p6 = pnand %p864_p4, %p1058_p13 }
 0x238   : > { %p870_p8 = por %p869_p10, %p868_p11 }
 0x239   : > { %p866_p9 = pneg %p865_p6 }
 0x23b   : > { %p871_p1 = pnand %p870_p8, %p866_p9 }
 0x23d   : > { %874 = shalt.err (!%p871_p1)
}
 0x23e   : > { %715 = dma.vmem_to_hbm [thread:$0]  (%p1058_p13), %s1137_s29, 64, %s1135_s2, %s552_s30  }
 0x23f PF: > { %s577_s24 = sand.u32 1, %s913_s15   ;;  %p1205_p12 = scmp.ne.s32.totalorder %s1195_s26, 0 }
 0x240   : > { %p1206_p0 = scmp.ge.s32.totalorder %s933_s20, 2  ;;  %s578_s14 = scalar_lea.sflag [#allocation5], %s577_s24 }
 0x242   : > { %p726_p2 = pnand %p1206_p0, %p1205_p12 }
 0x244   : > { %p727_p3 = pneg %p726_p2 }
 0x246   : > { %908 = dma.done.wait (%p727_p3), %s578_s14, 64  }
 0x247   : > { %910 = vsyncadd (%p727_p3), %s578_s14, 4294967232  ;;  %s21_s20 = sadd.s32 1, %s933_s20   ;;  %s1207_s15 = smov %s917_s16 }
 0x248   : > { %p18_p5 = scmp.ge.s32.totalorder %s21_s20, 4   ;;  %s1208_s16 = smov %s921_s17 }
 0x249   : > { %s1209_s17 = smov %s1067_s28  ;;  %s1210_s18 = smov %s929_s19 }
 0x24a   : > { %s1211_s19 = smov %s1213_s5  ;;  %20 = sbr.rel (!%p18_p5) target bundleno = 9 (0x9), region = 96 }
 0x24f   :  { %583 = vsyncpa [#allocation4], 1 }
 0x250   :  { %585 = vsyncpa [#allocation4 + $0x1], 1 }
 0x251   :  { %586 = vsyncpa [#allocation7], 1 }
 0x252   :  { %587 = vsyncpa [#allocation5], 1 }
 0x253   :  { %589 = vsyncpa [#allocation5 + $0x1], 1 }

</bundles_post_ra>
